<compile_context>
chip_gen: v6e
topology: v6e:2x2x1
jax: 0.10.0
libtpu: 0.0.40
codegen_flags: <defaults>
</compile_context>

<pallas_src>
import functools

import jax
import jax.numpy as jnp
from jax import lax
from jax.experimental import pallas as pl
from jax.experimental.pallas import tpu as pltpu


# ----------------------------------------------------------------------------
# Kernel
# ----------------------------------------------------------------------------
def _lstm_value_kernel(tok_ref, tab_ref, h0_ref, c0_ref, w_ih_ref, w_hh_ref,
                       b_ref, fc_w_ref, fc_b_ref,
                       value_ref, h_out_ref, c_out_ref,
                       xproj_ref,
                       *, hidden_dim, seq_len, batch_chunk, vocab_size):
    H, T, Bc, V = hidden_dim, seq_len, batch_chunk, vocab_size

    # --- In-kernel embedding gather via one-hot MXU matmul -------------------
    # tokens are (T*Bc, 1) int32, time-major within this batch chunk.
    tok = tok_ref[...]                                            # (T*Bc, 1)
    iota = lax.broadcasted_iota(jnp.int32, (T * Bc, V), 1)
    onehot = jnp.where(iota == tok, 1.0, 0.0).astype(jnp.bfloat16)  # exact 0/1
    emb = jnp.dot(onehot, tab_ref[...],
                  preferred_element_type=jnp.float32)             # (T*Bc, H)
    emb = emb.astype(jnp.bfloat16)                                # == bf16 table rows

    # --- Hoisted input projection for ALL time steps (one MXU matmul) --------
    # Stored to explicit VMEM scratch so the unrolled loop reads aligned
    # (Bc, 4H) slices instead of keeping the whole value live in vregs.
    xproj_ref[...] = (jnp.dot(emb, w_ih_ref[...],
                              preferred_element_type=jnp.float32)
                      + b_ref[...])

    w_hh = w_hh_ref[...]                                          # (H, 4H) bf16
    h = h0_ref[...]                                               # (Bc, H) f32
    c = c0_ref[...]

    # --- Serial recurrence, fully unrolled (T is small & static) -------------
    # Gate order is (i, f, o, g); the 0.5 sigmoid->tanh pre-scale is already
    # folded into the i/f/o columns of W_ih/W_hh/b, so one tanh over the whole
    # (Bc, 4H) tile covers all gates: sigmoid(x) = 0.5*tanh(0.5*x) + 0.5.
    for t in range(T):
        x_t = xproj_ref[pl.ds(t * Bc, Bc), :]                     # static, aligned
        gates = x_t + jnp.dot(h.astype(jnp.bfloat16), w_hh,
                              preferred_element_type=jnp.float32)  # (Bc, 4H)
        y = jnp.tanh(gates)                                       # single EUP pass
        sig = 0.5 * y[:, :3 * H] + 0.5                            # i, f, o fixup (VPU)
        i_g = sig[:, 0 * H:1 * H]
        f_g = sig[:, 1 * H:2 * H]
        o_g = sig[:, 2 * H:3 * H]
        g_g = y[:, 3 * H:4 * H]
        c = f_g * c + i_g * g_g
        h = o_g * jnp.tanh(c)

    h_out_ref[...] = h
    c_out_ref[...] = c
    # Value head: VPU multiply + lane reduction (avoids a 1-column MXU matmul).
    value_ref[...] = (jnp.sum(h * fc_w_ref[...], axis=-1, keepdims=True)
                      + fc_b_ref[...])


# ----------------------------------------------------------------------------
# One-time weight prep (outside the jitted forward)
# ----------------------------------------------------------------------------
def _reorder_ifgo_to_ifog(x):
    """Reorder last-dim gate blocks from torch order (i, f, g, o) to (i, f, o, g)."""
    H = x.shape[-1] // 4
    return jnp.concatenate([x[..., :2 * H], x[..., 3 * H:4 * H],
                            x[..., 2 * H:3 * H]], axis=-1)


def prepare_params(params):
    """Gate reorder + sigmoid->tanh 0.5 pre-scale folding + bf16 cast, done once."""
    H = params["embedding"].shape[1]
    # i/f/o columns pre-scaled by 0.5 (exact in bf16: power-of-two scale), g untouched.
    scale = jnp.concatenate([jnp.full((3 * H,), 0.5, jnp.float32),
                             jnp.ones((H,), jnp.float32)])[None, :]
    w_ih = _reorder_ifgo_to_ifog(params["w_ih"]) * scale
    w_hh = _reorder_ifgo_to_ifog(params["w_hh"]) * scale
    b = _reorder_ifgo_to_ifog(params["b"]) * scale
    return {
        "embedding": params["embedding"].astype(jnp.bfloat16),   # (V, H)
        "w_ih": w_ih.astype(jnp.bfloat16),                       # (H, 4H)
        "w_hh": w_hh.astype(jnp.bfloat16),                       # (H, 4H)
        "b": b.astype(jnp.float32),                              # (1, 4H)
        "fc_w_row": params["fc_w"].T.astype(jnp.float32),        # (1, H)
        "fc_b": params["fc_b"].astype(jnp.float32),              # (1, 1)
    }


# ----------------------------------------------------------------------------
# Forward wrapper
# ----------------------------------------------------------------------------
@jax.jit
def value_network_forward(tokens, hidden, prep):
    """tokens: (B, T) int32; hidden: (h0, c0) each (1, B, H); prep from prepare_params.
    Returns (value (B,), (h (1,B,H), c (1,B,H)))."""
    h0, c0 = hidden
    B, T = tokens.shape
    V, H = prep["embedding"].shape

    Bp = max(8, ((B + 7) // 8) * 8)            # sublane-padded batch
    # Split batch across v7x's two TensorCores when chunks stay lane-aligned.
    n_chunks = 2 if (Bp % 256 == 0) else 1
    Bc = Bp // n_chunks

    if Bp != B:
        tokens_p = jnp.concatenate(
            [tokens, jnp.zeros((Bp - B, T), tokens.dtype)], axis=0)
    else:
        tokens_p = tokens
    # Tiny int32 reshuffle: time-major flat tokens per batch chunk.
    tok_tm = (tokens_p.astype(jnp.int32)
              .reshape(n_chunks, Bc, T)
              .transpose(0, 2, 1)
              .reshape(n_chunks, T * Bc, 1))

    h0_p = jnp.pad(h0[0].astype(jnp.float32), ((0, Bp - B), (0, 0)))
    c0_p = jnp.pad(c0[0].astype(jnp.float32), ((0, Bp - B), (0, 0)))

    kernel = functools.partial(_lstm_value_kernel, hidden_dim=H, seq_len=T,
                               batch_chunk=Bc, vocab_size=V)

    whole = pl.BlockSpec(memory_space=pltpu.MemorySpace.VMEM)

    # Advisory cost + VMEM budget (static Python ints).
    flops = (2 * T * Bp * V * H            # one-hot gather matmul
             + 2 * T * Bp * H * 4 * H      # hoisted input projection
             + 2 * T * Bp * H * 4 * H      # recurrent h @ W_hh
             + 2 * Bp * H)                 # value head
    transcendentals = 5 * T * Bp * H
    in_bytes = (n_chunks * T * Bc * 4 + V * H * 2 + 2 * Bp * H * 4
                + 2 * H * 4 * H * 2 + 4 * H * 4 + H * 4 + 4)
    out_bytes = Bp * 4 + 2 * Bp * H * 4
    scratch_bytes = T * Bc * 4 * H * 4
    vmem_budget = int(min(max(2 * (in_bytes + out_bytes + scratch_bytes),
                              4 << 20), 60 << 20))

    value_p, h_p, c_p = pl.pallas_call(
        kernel,
        grid=(n_chunks,),
        in_specs=[
            pl.BlockSpec((None, T * Bc, 1), lambda i: (i, 0, 0)),   # tokens
            whole,                                                   # emb table (bf16)
            pl.BlockSpec((Bc, H), lambda i: (i, 0)),                 # h0
            pl.BlockSpec((Bc, H), lambda i: (i, 0)),                 # c0
            whole, whole, whole, whole, whole,   # w_ih, w_hh, b, fc_w_row, fc_b
        ],
        out_specs=(
            pl.BlockSpec((Bc, 1), lambda i: (i, 0)),
            pl.BlockSpec((Bc, H), lambda i: (i, 0)),
            pl.BlockSpec((Bc, H), lambda i: (i, 0)),
        ),
        out_shape=(
            jax.ShapeDtypeStruct((Bp, 1), jnp.float32),
            jax.ShapeDtypeStruct((Bp, H), jnp.float32),
            jax.ShapeDtypeStruct((Bp, H), jnp.float32),
        ),
        scratch_shapes=[pltpu.VMEM((T * Bc, 4 * H), jnp.float32)],
        compiler_params=pltpu.CompilerParams(
            dimension_semantics=("parallel",),
            vmem_limit_bytes=vmem_budget),
        cost_estimate=pl.CostEstimate(flops=flops,
                                      transcendentals=transcendentals,
                                      bytes_accessed=in_bytes + out_bytes),
    )(tok_tm, prep["embedding"], h0_p, c0_p, prep["w_ih"], prep["w_hh"],
      prep["b"], prep["fc_w_row"], prep["fc_b"])

    value = value_p[:B, 0]
    return value, (h_p[:B][None], c_p[:B][None])


# ----------------------------------------------------------------------------
# Pure-JAX reference (torch.nn.LSTM semantics, gate order i,f,g,o)
# ----------------------------------------------------------------------------
def _reference_forward(tokens, hidden, params, *, quantized=False):
    """quantized=True mirrors the kernel's bf16 storage (bf16 table/W_ih/W_hh and
    bf16 hidden-state feed) with f32 math; quantized=False is the full-f32 module."""
    h0, c0 = hidden
    H = params["embedding"].shape[1]
    cast = ((lambda a: a.astype(jnp.bfloat16).astype(jnp.float32))
            if quantized else (lambda a: a))
    emb = jnp.take(cast(params["embedding"]), tokens, axis=0)     # (B, T, H)
    w_ih, w_hh = cast(params["w_ih"]), cast(params["w_hh"])

    def step(carry, x_t):
        h, c = carry
        gates = x_t @ w_ih + cast(h) @ w_hh + params["b"]
        i = jax.nn.sigmoid(gates[:, 0 * H:1 * H])
        f = jax.nn.sigmoid(gates[:, 1 * H:2 * H])
        g = jnp.tanh(gates[:, 2 * H:3 * H])
        o = jax.nn.sigmoid(gates[:, 3 * H:4 * H])
        c_new = f * c + i * g
        h_new = o * jnp.tanh(c_new)
        return (h_new, c_new), h_new

    (h_f, c_f), _ = lax.scan(step, (h0[0], c0[0]),
                             jnp.transpose(emb, (1, 0, 2)))
    value = (h_f @ params["fc_w"] + params["fc_b"])[:, 0]
    return value, (h_f[None], c_f[None])


def init_params(key, vocab_size, hidden_dim):
    """Deterministic init mimicking PyTorch defaults; torch gate order (i,f,g,o)."""
    H = hidden_dim
    k = jax.random.split(key, 7)
    bound = 1.0 / jnp.sqrt(H)
    u = lambda kk, shape: jax.random.uniform(kk, shape, jnp.float32, -bound, bound)
    emb = jax.random.normal(k[0], (vocab_size, H), jnp.float32)
    w_ih = u(k[1], (4 * H, H))
    w_hh = u(k[2], (4 * H, H))
    b_ih = u(k[3], (4 * H,))
    b_hh = u(k[4], (4 * H,))
    fc_w = u(k[5], (1, H))
    fc_b = u(k[6], (1,))
    return {
        "embedding": emb,
        "w_ih": w_ih.T,                      # (H, 4H)
        "w_hh": w_hh.T,                      # (H, 4H)
        "b": (b_ih + b_hh)[None, :],         # (1, 4H)
        "fc_w": fc_w.T,                      # (H, 1)
        "fc_b": fc_b[None, :],               # (1, 1)
    }


if __name__ == "__main__":
    VOCAB, HIDDEN, BATCH, SEQ = 50, 32, 2, 8

    key = jax.random.PRNGKey(0)
    k_param, k_tok = jax.random.split(key)
    params = init_params(k_param, VOCAB, HIDDEN)
    prep = prepare_params(params)            # one-time weight prep

    tokens = jax.random.randint(k_tok, (BATCH, SEQ), 0, VOCAB, dtype=jnp.int32)
    h0 = jnp.zeros((1, BATCH, HIDDEN), jnp.float32)   # init_hidden()
    c0 = jnp.zeros((1, BATCH, HIDDEN), jnp.float32)

    value, (h_n, c_n) = value_network_forward(tokens, (h0, c0), prep)
    jax.block_until_ready((value, h_n, c_n))

    assert value.shape == (BATCH,)
    assert h_n.shape == (1, BATCH, HIDDEN) and c_n.shape == (1, BATCH, HIDDEN)

    # Strict check: same bf16-quantized weights, full torch-LSTM gate semantics.
    v_q, (h_q, c_q) = _reference_forward(tokens, (h0, c0), params, quantized=True)
    assert jnp.allclose(value, v_q, atol=1e-3)
    assert jnp.allclose(h_n, h_q, atol=1e-3)
    assert jnp.allclose(c_n, c_q, atol=1e-3)

    # Sanity check: bf16 weight storage stays close to the full-f32 module output.
    v_f, _ = _reference_forward(tokens, (h0, c0), params, quantized=False)
    assert jnp.allclose(value, v_f, atol=5e-2)

    print("KERNEL_OK")
</pallas_src>

<mosaic_0001>
module attributes {stable_mosaic.version = 11 : i64} {
  func.func @_lstm_value_kernel(%arg0: i32, %arg1: memref<1x64x1xi32, #tpu.memory_space<vmem>>, %arg2: memref<50x32xbf16, #tpu.memory_space<vmem>>, %arg3: memref<8x32xf32, #tpu.memory_space<vmem>>, %arg4: memref<8x32xf32, #tpu.memory_space<vmem>>, %arg5: memref<32x128xbf16, #tpu.memory_space<vmem>>, %arg6: memref<32x128xbf16, #tpu.memory_space<vmem>>, %arg7: memref<1x128xf32, #tpu.memory_space<vmem>>, %arg8: memref<1x32xf32, #tpu.memory_space<vmem>>, %arg9: memref<1x1xf32, #tpu.memory_space<vmem>>, %arg10: memref<8x1xf32, #tpu.memory_space<vmem>>, %arg11: memref<8x32xf32, #tpu.memory_space<vmem>>, %arg12: memref<8x32xf32, #tpu.memory_space<vmem>>, %arg13: memref<64x128xf32, #tpu.memory_space<vmem>>) attributes {dimension_semantics = [#tpu.dimension_semantics<parallel>], iteration_bounds = array<i64: 1>, scalar_prefetch = 0 : i64, scratch_operands = 1 : i64, tpu.core_type = #tpu.core_type<tc>, window_params = [{transform_indices = @transform_0, window_bounds = array<i64: 1, 64, 1>}, {pipeline_mode = #tpu.pipeline_mode<synchronous>, transform_indices = @transform_1, window_bounds = array<i64: 50, 32>}, {transform_indices = @transform_2, window_bounds = array<i64: 8, 32>}, {transform_indices = @transform_3, window_bounds = array<i64: 8, 32>}, {pipeline_mode = #tpu.pipeline_mode<synchronous>, transform_indices = @transform_4, window_bounds = array<i64: 32, 128>}, {pipeline_mode = #tpu.pipeline_mode<synchronous>, transform_indices = @transform_5, window_bounds = array<i64: 32, 128>}, {pipeline_mode = #tpu.pipeline_mode<synchronous>, transform_indices = @transform_6, window_bounds = array<i64: 1, 128>}, {pipeline_mode = #tpu.pipeline_mode<synchronous>, transform_indices = @transform_7, window_bounds = array<i64: 1, 32>}, {pipeline_mode = #tpu.pipeline_mode<synchronous>, transform_indices = @transform_8, window_bounds = array<i64: 1, 1>}, {transform_indices = @transform_9, window_bounds = array<i64: 8, 1>}, {transform_indices = @transform_10, window_bounds = array<i64: 8, 32>}, {transform_indices = @transform_11, window_bounds = array<i64: 8, 32>}]} {
    %c0 = arith.constant 0 : index
    %c0_0 = arith.constant 0 : index
    %c0_1 = arith.constant 0 : index
    %0 = vector.load %arg1[%c0, %c0_0, %c0_1] : memref<1x64x1xi32, #tpu.memory_space<vmem>>, vector<1x64x1xi32>
    %1 = vector.shape_cast %0 : vector<1x64x1xi32> to vector<64x1xi32>
    %2 = tpu.iota {dimensions = array<i32: 1>} : vector<64x50xi32>
    %3 = vector.broadcast %1 : vector<64x1xi32> to vector<64x50xi32>
    %4 = arith.cmpi eq, %2, %3 : vector<64x50xi32>
    %cst = arith.constant 1.000000e+00 : f32
    %cst_2 = arith.constant 0.000000e+00 : f32
    %5 = vector.broadcast %cst : f32 to vector<64x50xf32>
    %6 = vector.broadcast %cst_2 : f32 to vector<64x50xf32>
    %7 = arith.select %4, %5, %6 : vector<64x50xi1>, vector<64x50xf32>
    %8 = arith.truncf %7 : vector<64x50xf32> to vector<64x50xbf16>
    %c0_3 = arith.constant 0 : index
    %c0_4 = arith.constant 0 : index
    %9 = vector.load %arg2[%c0_3, %c0_4] : memref<50x32xbf16, #tpu.memory_space<vmem>>, vector<50x32xbf16>
    %cst_5 = arith.constant dense<0.000000e+00> : vector<64x32xf32>
    %10 = tpu.matmul %8, %9, %cst_5 {dimension_numbers = #tpu.dot_dimension_numbers<[1], [0], [0], [1], [0, 0, 1, 1], [], []>} : vector<64x50xbf16>, vector<50x32xbf16>, vector<64x32xf32> -> vector<64x32xf32>
    %11 = arith.truncf %10 : vector<64x32xf32> to vector<64x32xbf16>
    %c0_6 = arith.constant 0 : index
    %c0_7 = arith.constant 0 : index
    %12 = vector.load %arg5[%c0_6, %c0_7] : memref<32x128xbf16, #tpu.memory_space<vmem>>, vector<32x128xbf16>
    %cst_8 = arith.constant dense<0.000000e+00> : vector<64x128xf32>
    %13 = tpu.matmul %11, %12, %cst_8 {dimension_numbers = #tpu.dot_dimension_numbers<[1], [0], [0], [1], [0, 0, 1, 1], [], []>} : vector<64x32xbf16>, vector<32x128xbf16>, vector<64x128xf32> -> vector<64x128xf32>
    %c0_9 = arith.constant 0 : index
    %c0_10 = arith.constant 0 : index
    %14 = vector.load %arg7[%c0_9, %c0_10] : memref<1x128xf32, #tpu.memory_space<vmem>>, vector<1x128xf32>
    %15 = vector.broadcast %14 : vector<1x128xf32> to vector<64x128xf32>
    %16 = arith.addf %13, %15 : vector<64x128xf32>
    %c0_11 = arith.constant 0 : index
    %c0_12 = arith.constant 0 : index
    %17 = vector.load %arg13[%c0_11, %c0_12] : memref<64x128xf32, #tpu.memory_space<vmem>>, vector<64x128xf32>
    tpu.vector_store %arg13[%c0_11, %c0_12], %16 {strides = array<i32>} : memref<64x128xf32, #tpu.memory_space<vmem>>, vector<64x128xf32>,
    %c0_13 = arith.constant 0 : index
    %c0_14 = arith.constant 0 : index
    %18 = vector.load %arg6[%c0_13, %c0_14] : memref<32x128xbf16, #tpu.memory_space<vmem>>, vector<32x128xbf16>
    %c0_15 = arith.constant 0 : index
    %c0_16 = arith.constant 0 : index
    %19 = vector.load %arg3[%c0_15, %c0_16] : memref<8x32xf32, #tpu.memory_space<vmem>>, vector<8x32xf32>
    %c0_17 = arith.constant 0 : index
    %c0_18 = arith.constant 0 : index
    %20 = vector.load %arg4[%c0_17, %c0_18] : memref<8x32xf32, #tpu.memory_space<vmem>>, vector<8x32xf32>
    %c0_19 = arith.constant 0 : index
    %c0_20 = arith.constant 0 : index
    %21 = vector.load %arg13[%c0_19, %c0_20] : memref<64x128xf32, #tpu.memory_space<vmem>>, vector<8x128xf32>
    %22 = arith.truncf %19 : vector<8x32xf32> to vector<8x32xbf16>
    %cst_21 = arith.constant dense<0.000000e+00> : vector<8x128xf32>
    %23 = tpu.matmul %22, %18, %cst_21 {dimension_numbers = #tpu.dot_dimension_numbers<[1], [0], [0], [1], [0, 0, 1, 1], [], []>} : vector<8x32xbf16>, vector<32x128xbf16>, vector<8x128xf32> -> vector<8x128xf32>
    %24 = arith.addf %21, %23 : vector<8x128xf32>
    %25 = math.tanh %24 : vector<8x128xf32>
    %26 = vector.extract_strided_slice %25 {offsets = [0, 0], sizes = [8, 96], strides = [1, 1]} : vector<8x128xf32> to vector<8x96xf32>
    %cst_22 = arith.constant 5.000000e-01 : f32
    %27 = vector.broadcast %cst_22 : f32 to vector<8x96xf32>
    %28 = arith.mulf %27, %26 : vector<8x96xf32>
    %cst_23 = arith.constant 5.000000e-01 : f32
    %29 = vector.broadcast %cst_23 : f32 to vector<8x96xf32>
    %30 = arith.addf %28, %29 : vector<8x96xf32>
    %31 = vector.extract_strided_slice %30 {offsets = [0, 0], sizes = [8, 32], strides = [1, 1]} : vector<8x96xf32> to vector<8x32xf32>
    %32 = vector.extract_strided_slice %30 {offsets = [0, 32], sizes = [8, 32], strides = [1, 1]} : vector<8x96xf32> to vector<8x32xf32>
    %33 = vector.extract_strided_slice %30 {offsets = [0, 64], sizes = [8, 32], strides = [1, 1]} : vector<8x96xf32> to vector<8x32xf32>
    %34 = vector.extract_strided_slice %25 {offsets = [0, 96], sizes = [8, 32], strides = [1, 1]} : vector<8x128xf32> to vector<8x32xf32>
    %35 = arith.mulf %32, %20 : vector<8x32xf32>
    %36 = arith.mulf %31, %34 : vector<8x32xf32>
    %37 = arith.addf %35, %36 : vector<8x32xf32>
    %38 = math.tanh %37 : vector<8x32xf32>
    %39 = arith.mulf %33, %38 : vector<8x32xf32>
    %c8 = arith.constant 8 : index
    %c0_24 = arith.constant 0 : index
    %40 = vector.load %arg13[%c8, %c0_24] : memref<64x128xf32, #tpu.memory_space<vmem>>, vector<8x128xf32>
    %41 = arith.truncf %39 : vector<8x32xf32> to vector<8x32xbf16>
    %cst_25 = arith.constant dense<0.000000e+00> : vector<8x128xf32>
    %42 = tpu.matmul %41, %18, %cst_25 {dimension_numbers = #tpu.dot_dimension_numbers<[1], [0], [0], [1], [0, 0, 1, 1], [], []>} : vector<8x32xbf16>, vector<32x128xbf16>, vector<8x128xf32> -> vector<8x128xf32>
    %43 = arith.addf %40, %42 : vector<8x128xf32>
    %44 = math.tanh %43 : vector<8x128xf32>
    %45 = vector.extract_strided_slice %44 {offsets = [0, 0], sizes = [8, 96], strides = [1, 1]} : vector<8x128xf32> to vector<8x96xf32>
    %cst_26 = arith.constant 5.000000e-01 : f32
    %46 = vector.broadcast %cst_26 : f32 to vector<8x96xf32>
    %47 = arith.mulf %46, %45 : vector<8x96xf32>
    %cst_27 = arith.constant 5.000000e-01 : f32
    %48 = vector.broadcast %cst_27 : f32 to vector<8x96xf32>
    %49 = arith.addf %47, %48 : vector<8x96xf32>
    %50 = vector.extract_strided_slice %49 {offsets = [0, 0], sizes = [8, 32], strides = [1, 1]} : vector<8x96xf32> to vector<8x32xf32>
    %51 = vector.extract_strided_slice %49 {offsets = [0, 32], sizes = [8, 32], strides = [1, 1]} : vector<8x96xf32> to vector<8x32xf32>
    %52 = vector.extract_strided_slice %49 {offsets = [0, 64], sizes = [8, 32], strides = [1, 1]} : vector<8x96xf32> to vector<8x32xf32>
    %53 = vector.extract_strided_slice %44 {offsets = [0, 96], sizes = [8, 32], strides = [1, 1]} : vector<8x128xf32> to vector<8x32xf32>
    %54 = arith.mulf %51, %37 : vector<8x32xf32>
    %55 = arith.mulf %50, %53 : vector<8x32xf32>
    %56 = arith.addf %54, %55 : vector<8x32xf32>
    %57 = math.tanh %56 : vector<8x32xf32>
    %58 = arith.mulf %52, %57 : vector<8x32xf32>
    %c16 = arith.constant 16 : index
    %c0_28 = arith.constant 0 : index
    %59 = vector.load %arg13[%c16, %c0_28] : memref<64x128xf32, #tpu.memory_space<vmem>>, vector<8x128xf32>
    %60 = arith.truncf %58 : vector<8x32xf32> to vector<8x32xbf16>
    %cst_29 = arith.constant dense<0.000000e+00> : vector<8x128xf32>
    %61 = tpu.matmul %60, %18, %cst_29 {dimension_numbers = #tpu.dot_dimension_numbers<[1], [0], [0], [1], [0, 0, 1, 1], [], []>} : vector<8x32xbf16>, vector<32x128xbf16>, vector<8x128xf32> -> vector<8x128xf32>
    %62 = arith.addf %59, %61 : vector<8x128xf32>
    %63 = math.tanh %62 : vector<8x128xf32>
    %64 = vector.extract_strided_slice %63 {offsets = [0, 0], sizes = [8, 96], strides = [1, 1]} : vector<8x128xf32> to vector<8x96xf32>
    %cst_30 = arith.constant 5.000000e-01 : f32
    %65 = vector.broadcast %cst_30 : f32 to vector<8x96xf32>
    %66 = arith.mulf %65, %64 : vector<8x96xf32>
    %cst_31 = arith.constant 5.000000e-01 : f32
    %67 = vector.broadcast %cst_31 : f32 to vector<8x96xf32>
    %68 = arith.addf %66, %67 : vector<8x96xf32>
    %69 = vector.extract_strided_slice %68 {offsets = [0, 0], sizes = [8, 32], strides = [1, 1]} : vector<8x96xf32> to vector<8x32xf32>
    %70 = vector.extract_strided_slice %68 {offsets = [0, 32], sizes = [8, 32], strides = [1, 1]} : vector<8x96xf32> to vector<8x32xf32>
    %71 = vector.extract_strided_slice %68 {offsets = [0, 64], sizes = [8, 32], strides = [1, 1]} : vector<8x96xf32> to vector<8x32xf32>
    %72 = vector.extract_strided_slice %63 {offsets = [0, 96], sizes = [8, 32], strides = [1, 1]} : vector<8x128xf32> to vector<8x32xf32>
    %73 = arith.mulf %70, %56 : vector<8x32xf32>
    %74 = arith.mulf %69, %72 : vector<8x32xf32>
    %75 = arith.addf %73, %74 : vector<8x32xf32>
    %76 = math.tanh %75 : vector<8x32xf32>
    %77 = arith.mulf %71, %76 : vector<8x32xf32>
    %c24 = arith.constant 24 : index
    %c0_32 = arith.constant 0 : index
    %78 = vector.load %arg13[%c24, %c0_32] : memref<64x128xf32, #tpu.memory_space<vmem>>, vector<8x128xf32>
    %79 = arith.truncf %77 : vector<8x32xf32> to vector<8x32xbf16>
    %cst_33 = arith.constant dense<0.000000e+00> : vector<8x128xf32>
    %80 = tpu.matmul %79, %18, %cst_33 {dimension_numbers = #tpu.dot_dimension_numbers<[1], [0], [0], [1], [0, 0, 1, 1], [], []>} : vector<8x32xbf16>, vector<32x128xbf16>, vector<8x128xf32> -> vector<8x128xf32>
    %81 = arith.addf %78, %80 : vector<8x128xf32>
    %82 = math.tanh %81 : vector<8x128xf32>
    %83 = vector.extract_strided_slice %82 {offsets = [0, 0], sizes = [8, 96], strides = [1, 1]} : vector<8x128xf32> to vector<8x96xf32>
    %cst_34 = arith.constant 5.000000e-01 : f32
    %84 = vector.broadcast %cst_34 : f32 to vector<8x96xf32>
    %85 = arith.mulf %84, %83 : vector<8x96xf32>
    %cst_35 = arith.constant 5.000000e-01 : f32
    %86 = vector.broadcast %cst_35 : f32 to vector<8x96xf32>
    %87 = arith.addf %85, %86 : vector<8x96xf32>
    %88 = vector.extract_strided_slice %87 {offsets = [0, 0], sizes = [8, 32], strides = [1, 1]} : vector<8x96xf32> to vector<8x32xf32>
    %89 = vector.extract_strided_slice %87 {offsets = [0, 32], sizes = [8, 32], strides = [1, 1]} : vector<8x96xf32> to vector<8x32xf32>
    %90 = vector.extract_strided_slice %87 {offsets = [0, 64], sizes = [8, 32], strides = [1, 1]} : vector<8x96xf32> to vector<8x32xf32>
    %91 = vector.extract_strided_slice %82 {offsets = [0, 96], sizes = [8, 32], strides = [1, 1]} : vector<8x128xf32> to vector<8x32xf32>
    %92 = arith.mulf %89, %75 : vector<8x32xf32>
    %93 = arith.mulf %88, %91 : vector<8x32xf32>
    %94 = arith.addf %92, %93 : vector<8x32xf32>
    %95 = math.tanh %94 : vector<8x32xf32>
    %96 = arith.mulf %90, %95 : vector<8x32xf32>
    %c32 = arith.constant 32 : index
    %c0_36 = arith.constant 0 : index
    %97 = vector.load %arg13[%c32, %c0_36] : memref<64x128xf32, #tpu.memory_space<vmem>>, vector<8x128xf32>
    %98 = arith.truncf %96 : vector<8x32xf32> to vector<8x32xbf16>
    %cst_37 = arith.constant dense<0.000000e+00> : vector<8x128xf32>
    %99 = tpu.matmul %98, %18, %cst_37 {dimension_numbers = #tpu.dot_dimension_numbers<[1], [0], [0], [1], [0, 0, 1, 1], [], []>} : vector<8x32xbf16>, vector<32x128xbf16>, vector<8x128xf32> -> vector<8x128xf32>
    %100 = arith.addf %97, %99 : vector<8x128xf32>
    %101 = math.tanh %100 : vector<8x128xf32>
    %102 = vector.extract_strided_slice %101 {offsets = [0, 0], sizes = [8, 96], strides = [1, 1]} : vector<8x128xf32> to vector<8x96xf32>
    %cst_38 = arith.constant 5.000000e-01 : f32
    %103 = vector.broadcast %cst_38 : f32 to vector<8x96xf32>
    %104 = arith.mulf %103, %102 : vector<8x96xf32>
    %cst_39 = arith.constant 5.000000e-01 : f32
    %105 = vector.broadcast %cst_39 : f32 to vector<8x96xf32>
    %106 = arith.addf %104, %105 : vector<8x96xf32>
    %107 = vector.extract_strided_slice %106 {offsets = [0, 0], sizes = [8, 32], strides = [1, 1]} : vector<8x96xf32> to vector<8x32xf32>
    %108 = vector.extract_strided_slice %106 {offsets = [0, 32], sizes = [8, 32], strides = [1, 1]} : vector<8x96xf32> to vector<8x32xf32>
    %109 = vector.extract_strided_slice %106 {offsets = [0, 64], sizes = [8, 32], strides = [1, 1]} : vector<8x96xf32> to vector<8x32xf32>
    %110 = vector.extract_strided_slice %101 {offsets = [0, 96], sizes = [8, 32], strides = [1, 1]} : vector<8x128xf32> to vector<8x32xf32>
    %111 = arith.mulf %108, %94 : vector<8x32xf32>
    %112 = arith.mulf %107, %110 : vector<8x32xf32>
    %113 = arith.addf %111, %112 : vector<8x32xf32>
    %114 = math.tanh %113 : vector<8x32xf32>
    %115 = arith.mulf %109, %114 : vector<8x32xf32>
    %c40 = arith.constant 40 : index
    %c0_40 = arith.constant 0 : index
    %116 = vector.load %arg13[%c40, %c0_40] : memref<64x128xf32, #tpu.memory_space<vmem>>, vector<8x128xf32>
    %117 = arith.truncf %115 : vector<8x32xf32> to vector<8x32xbf16>
    %cst_41 = arith.constant dense<0.000000e+00> : vector<8x128xf32>
    %118 = tpu.matmul %117, %18, %cst_41 {dimension_numbers = #tpu.dot_dimension_numbers<[1], [0], [0], [1], [0, 0, 1, 1], [], []>} : vector<8x32xbf16>, vector<32x128xbf16>, vector<8x128xf32> -> vector<8x128xf32>
    %119 = arith.addf %116, %118 : vector<8x128xf32>
    %120 = math.tanh %119 : vector<8x128xf32>
    %121 = vector.extract_strided_slice %120 {offsets = [0, 0], sizes = [8, 96], strides = [1, 1]} : vector<8x128xf32> to vector<8x96xf32>
    %cst_42 = arith.constant 5.000000e-01 : f32
    %122 = vector.broadcast %cst_42 : f32 to vector<8x96xf32>
    %123 = arith.mulf %122, %121 : vector<8x96xf32>
    %cst_43 = arith.constant 5.000000e-01 : f32
    %124 = vector.broadcast %cst_43 : f32 to vector<8x96xf32>
    %125 = arith.addf %123, %124 : vector<8x96xf32>
    %126 = vector.extract_strided_slice %125 {offsets = [0, 0], sizes = [8, 32], strides = [1, 1]} : vector<8x96xf32> to vector<8x32xf32>
    %127 = vector.extract_strided_slice %125 {offsets = [0, 32], sizes = [8, 32], strides = [1, 1]} : vector<8x96xf32> to vector<8x32xf32>
    %128 = vector.extract_strided_slice %125 {offsets = [0, 64], sizes = [8, 32], strides = [1, 1]} : vector<8x96xf32> to vector<8x32xf32>
    %129 = vector.extract_strided_slice %120 {offsets = [0, 96], sizes = [8, 32], strides = [1, 1]} : vector<8x128xf32> to vector<8x32xf32>
    %130 = arith.mulf %127, %113 : vector<8x32xf32>
    %131 = arith.mulf %126, %129 : vector<8x32xf32>
    %132 = arith.addf %130, %131 : vector<8x32xf32>
    %133 = math.tanh %132 : vector<8x32xf32>
    %134 = arith.mulf %128, %133 : vector<8x32xf32>
    %c48 = arith.constant 48 : index
    %c0_44 = arith.constant 0 : index
    %135 = vector.load %arg13[%c48, %c0_44] : memref<64x128xf32, #tpu.memory_space<vmem>>, vector<8x128xf32>
    %136 = arith.truncf %134 : vector<8x32xf32> to vector<8x32xbf16>
    %cst_45 = arith.constant dense<0.000000e+00> : vector<8x128xf32>
    %137 = tpu.matmul %136, %18, %cst_45 {dimension_numbers = #tpu.dot_dimension_numbers<[1], [0], [0], [1], [0, 0, 1, 1], [], []>} : vector<8x32xbf16>, vector<32x128xbf16>, vector<8x128xf32> -> vector<8x128xf32>
    %138 = arith.addf %135, %137 : vector<8x128xf32>
    %139 = math.tanh %138 : vector<8x128xf32>
    %140 = vector.extract_strided_slice %139 {offsets = [0, 0], sizes = [8, 96], strides = [1, 1]} : vector<8x128xf32> to vector<8x96xf32>
    %cst_46 = arith.constant 5.000000e-01 : f32
    %141 = vector.broadcast %cst_46 : f32 to vector<8x96xf32>
    %142 = arith.mulf %141, %140 : vector<8x96xf32>
    %cst_47 = arith.constant 5.000000e-01 : f32
    %143 = vector.broadcast %cst_47 : f32 to vector<8x96xf32>
    %144 = arith.addf %142, %143 : vector<8x96xf32>
    %145 = vector.extract_strided_slice %144 {offsets = [0, 0], sizes = [8, 32], strides = [1, 1]} : vector<8x96xf32> to vector<8x32xf32>
    %146 = vector.extract_strided_slice %144 {offsets = [0, 32], sizes = [8, 32], strides = [1, 1]} : vector<8x96xf32> to vector<8x32xf32>
    %147 = vector.extract_strided_slice %144 {offsets = [0, 64], sizes = [8, 32], strides = [1, 1]} : vector<8x96xf32> to vector<8x32xf32>
    %148 = vector.extract_strided_slice %139 {offsets = [0, 96], sizes = [8, 32], strides = [1, 1]} : vector<8x128xf32> to vector<8x32xf32>
    %149 = arith.mulf %146, %132 : vector<8x32xf32>
    %150 = arith.mulf %145, %148 : vector<8x32xf32>
    %151 = arith.addf %149, %150 : vector<8x32xf32>
    %152 = math.tanh %151 : vector<8x32xf32>
    %153 = arith.mulf %147, %152 : vector<8x32xf32>
    %c56 = arith.constant 56 : index
    %c0_48 = arith.constant 0 : index
    %154 = vector.load %arg13[%c56, %c0_48] : memref<64x128xf32, #tpu.memory_space<vmem>>, vector<8x128xf32>
    %155 = arith.truncf %153 : vector<8x32xf32> to vector<8x32xbf16>
    %cst_49 = arith.constant dense<0.000000e+00> : vector<8x128xf32>
    %156 = tpu.matmul %155, %18, %cst_49 {dimension_numbers = #tpu.dot_dimension_numbers<[1], [0], [0], [1], [0, 0, 1, 1], [], []>} : vector<8x32xbf16>, vector<32x128xbf16>, vector<8x128xf32> -> vector<8x128xf32>
    %157 = arith.addf %154, %156 : vector<8x128xf32>
    %158 = math.tanh %157 : vector<8x128xf32>
    %159 = vector.extract_strided_slice %158 {offsets = [0, 0], sizes = [8, 96], strides = [1, 1]} : vector<8x128xf32> to vector<8x96xf32>
    %cst_50 = arith.constant 5.000000e-01 : f32
    %160 = vector.broadcast %cst_50 : f32 to vector<8x96xf32>
    %161 = arith.mulf %160, %159 : vector<8x96xf32>
    %cst_51 = arith.constant 5.000000e-01 : f32
    %162 = vector.broadcast %cst_51 : f32 to vector<8x96xf32>
    %163 = arith.addf %161, %162 : vector<8x96xf32>
    %164 = vector.extract_strided_slice %163 {offsets = [0, 0], sizes = [8, 32], strides = [1, 1]} : vector<8x96xf32> to vector<8x32xf32>
    %165 = vector.extract_strided_slice %163 {offsets = [0, 32], sizes = [8, 32], strides = [1, 1]} : vector<8x96xf32> to vector<8x32xf32>
    %166 = vector.extract_strided_slice %163 {offsets = [0, 64], sizes = [8, 32], strides = [1, 1]} : vector<8x96xf32> to vector<8x32xf32>
    %167 = vector.extract_strided_slice %158 {offsets = [0, 96], sizes = [8, 32], strides = [1, 1]} : vector<8x128xf32> to vector<8x32xf32>
    %168 = arith.mulf %165, %151 : vector<8x32xf32>
    %169 = arith.mulf %164, %167 : vector<8x32xf32>
    %170 = arith.addf %168, %169 : vector<8x32xf32>
    %171 = math.tanh %170 : vector<8x32xf32>
    %172 = arith.mulf %166, %171 : vector<8x32xf32>
    %c0_52 = arith.constant 0 : index
    %c0_53 = arith.constant 0 : index
    %173 = vector.load %arg11[%c0_52, %c0_53] : memref<8x32xf32, #tpu.memory_space<vmem>>, vector<8x32xf32>
    tpu.vector_store %arg11[%c0_52, %c0_53], %172 {strides = array<i32>} : memref<8x32xf32, #tpu.memory_space<vmem>>, vector<8x32xf32>,
    %c0_54 = arith.constant 0 : index
    %c0_55 = arith.constant 0 : index
    %174 = vector.load %arg12[%c0_54, %c0_55] : memref<8x32xf32, #tpu.memory_space<vmem>>, vector<8x32xf32>
    tpu.vector_store %arg12[%c0_54, %c0_55], %170 {strides = array<i32>} : memref<8x32xf32, #tpu.memory_space<vmem>>, vector<8x32xf32>,
    %c0_56 = arith.constant 0 : index
    %c0_57 = arith.constant 0 : index
    %175 = vector.load %arg8[%c0_56, %c0_57] : memref<1x32xf32, #tpu.memory_space<vmem>>, vector<1x32xf32>
    %176 = vector.broadcast %175 : vector<1x32xf32> to vector<8x32xf32>
    %177 = arith.mulf %172, %176 : vector<8x32xf32>
    %cst_58 = arith.constant dense<0.000000e+00> : vector<8xf32>
    %178 = vector.multi_reduction <add>, %177, %cst_58 [1] : vector<8x32xf32> to vector<8xf32>
    %179 = vector.shape_cast %178 : vector<8xf32> to vector<8x1xf32>
    %c0_59 = arith.constant 0 : index
    %c0_60 = arith.constant 0 : index
    %180 = vector.load %arg9[%c0_59, %c0_60] : memref<1x1xf32, #tpu.memory_space<vmem>>, vector<1x1xf32>
    %181 = vector.broadcast %180 : vector<1x1xf32> to vector<8x1xf32>
    %182 = arith.addf %179, %181 : vector<8x1xf32>
    %c0_61 = arith.constant 0 : index
    %c0_62 = arith.constant 0 : index
    %183 = vector.load %arg10[%c0_61, %c0_62] : memref<8x1xf32, #tpu.memory_space<vmem>>, vector<8x1xf32>
    tpu.vector_store %arg10[%c0_61, %c0_62], %182 {strides = array<i32>} : memref<8x1xf32, #tpu.memory_space<vmem>>, vector<8x1xf32>,
    return
  }
  func.func @transform_0(%arg0: i32) -> (i32, i32, i32) {
    %c0_i32 = arith.constant 0 : i32
    %c0_i32_0 = arith.constant 0 : i32
    %c0_i32_1 = arith.constant 0 : i32
    return %arg0, %c0_i32, %c0_i32_0 : i32, i32, i32
  }
  func.func @transform_1(%arg0: i32) -> (i32, i32) {
    %c0_i32 = arith.constant 0 : i32
    %c0_i32_0 = arith.constant 0 : i32
    %c0_i32_1 = arith.constant 0 : i32
    return %c0_i32, %c0_i32_0 : i32, i32
  }
  func.func @transform_2(%arg0: i32) -> (i32, i32) {
    %c0_i32 = arith.constant 0 : i32
    %c0_i32_0 = arith.constant 0 : i32
    return %arg0, %c0_i32 : i32, i32
  }
  func.func @transform_3(%arg0: i32) -> (i32, i32) {
    %c0_i32 = arith.constant 0 : i32
    %c0_i32_0 = arith.constant 0 : i32
    return %arg0, %c0_i32 : i32, i32
  }
  func.func @transform_4(%arg0: i32) -> (i32, i32) {
    %c0_i32 = arith.constant 0 : i32
    %c0_i32_0 = arith.constant 0 : i32
    %c0_i32_1 = arith.constant 0 : i32
    return %c0_i32, %c0_i32_0 : i32, i32
  }
  func.func @transform_5(%arg0: i32) -> (i32, i32) {
    %c0_i32 = arith.constant 0 : i32
    %c0_i32_0 = arith.constant 0 : i32
    %c0_i32_1 = arith.constant 0 : i32
    return %c0_i32, %c0_i32_0 : i32, i32
  }
  func.func @transform_6(%arg0: i32) -> (i32, i32) {
    %c0_i32 = arith.constant 0 : i32
    %c0_i32_0 = arith.constant 0 : i32
    %c0_i32_1 = arith.constant 0 : i32
    return %c0_i32, %c0_i32_0 : i32, i32
  }
  func.func @transform_7(%arg0: i32) -> (i32, i32) {
    %c0_i32 = arith.constant 0 : i32
    %c0_i32_0 = arith.constant 0 : i32
    %c0_i32_1 = arith.constant 0 : i32
    return %c0_i32, %c0_i32_0 : i32, i32
  }
  func.func @transform_8(%arg0: i32) -> (i32, i32) {
    %c0_i32 = arith.constant 0 : i32
    %c0_i32_0 = arith.constant 0 : i32
    %c0_i32_1 = arith.constant 0 : i32
    return %c0_i32, %c0_i32_0 : i32, i32
  }
  func.func @transform_9(%arg0: i32) -> (i32, i32) {
    %c0_i32 = arith.constant 0 : i32
    %c0_i32_0 = arith.constant 0 : i32
    return %arg0, %c0_i32 : i32, i32
  }
  func.func @transform_10(%arg0: i32) -> (i32, i32) {
    %c0_i32 = arith.constant 0 : i32
    %c0_i32_0 = arith.constant 0 : i32
    return %arg0, %c0_i32 : i32, i32
  }
  func.func @transform_11(%arg0: i32) -> (i32, i32) {
    %c0_i32 = arith.constant 0 : i32
    %c0_i32_0 = arith.constant 0 : i32
    return %arg0, %c0_i32 : i32, i32
  }
}

</mosaic_0001>

<bundles_post_ra>
// kernel: value_network_forward.1
= control target key start
LH: loop header
LB: loop body
LE: loop exit
PB: predicated region body
PF: predicated region fallthrough
CT: control target
= control target key end

     0   :  { %v1141_v0 = vmov 0   ;;  %vm133_vm0 = vcmask 1040384   ;;  %v1142_v14 = vmov 0.0   ;;  %v46_v15 = vlaneseq  ;;  %s1144_s29 = smov 32   ;;  %s1411_s0 = inlined_call_operand.vmem [shape: s32[1,64,1], index: 0, kind: input, shape index: {}]   ;;  %s1412_s1 = inlined_call_operand.vmem [shape: bf16[50,32], index: 1, kind: input, shape index: {}]   ;;  %s1413_s4 = inlined_call_operand.vmem [shape: bf16[32,128], index: 4, kind: input, shape index: {}]   ;;  %s1414_s5 = inlined_call_operand.vmem [shape: bf16[32,128], index: 5, kind: input, shape index: {}]   ;;  %s1415_s3 = inlined_call_operand.vmem [shape: f32[8,32], index: 3, kind: input, shape index: {}]   ;;  %s1416_s2 = inlined_call_operand.vmem [shape: f32[8,32], index: 2, kind: input, shape index: {}]   ;;  %s1417_s6 = inlined_call_operand.vmem [shape: f32[1,128], index: 6, kind: input, shape index: {}]   ;;  %s1418_s7 = inlined_call_operand.vmem [shape: f32[1,32], index: 7, kind: input, shape index: {}]   ;;  %s1419_s8 = inlined_call_operand.<no memory space> [shape: f32[1,1], index: 8, kind: input, shape index: {}]   ;;  %s1420_s10 = inlined_call_operand.vmem [shape: f32[8,32], index: 10, kind: output, shape index: {1}]   ;;  %s1421_s11 = inlined_call_operand.vmem [shape: f32[8,32], index: 11, kind: output, shape index: {2}]   ;;  %s1422_s9 = inlined_call_operand.vmem [shape: f32[8,1], index: 9, kind: output, shape index: {0}]  }
   0x1   :  { %1100 = vset.pattern.permute.xlu1 %v1141_v0  ;;  %1099 = vset.pattern.permute.xlu0 %v1141_v0  ;;  %v40_v1 = vld [vmem:[%s1411_s0 + $0x10] sm:$0xff]  ;;  %v38_v2 = vld [vmem:[%s1411_s0] sm:$0xff]  ;;  %v41_v3 = vld [vmem:[%s1411_s0 + $0x18] sm:$0xff]  ;;  %vm120_vm5 = vcmask 408576   ;;  %vm1143_vm10 = vmmov 0   ;;  %vm229_vm11 = vcmask 261120  }
   0x2   :  { %55 = vperm.xlu1 %1100, %v40_v1   ;;  %49 = vperm.xlu0 %1099, %v38_v2   ;;  %v39_v4 = vld [vmem:[%s1411_s0 + $0x8] sm:$0xff]  ;;  %v1101_v5 = vld [vmem:[%s1412_s1 + $0x18] ss:$0 sps:$4 sm:$0x11]   ;;  %v1102_v6 = vld [vmem:[%s1412_s1 + $0x10] sm:$0xff]   ;;  %v47_v16 = vand.u32 127, %v46_v15 }
   0x3   :  { %v135_v7 = vsel %vm133_vm0, %v1101_v5, 0  ;;  %v43_v8 = vld [vmem:[%s1411_s0 + $0x28] sm:$0xff]  ;;  %v42_v9 = vld [vmem:[%s1411_s0 + $0x20] sm:$0xff]  ;;  %1092 = vmatprep.subr.msk.bf16.mxu0 %vm133_vm0, %v1101_v5  ;;  %v45_v11 = vld [vmem:[%s1411_s0 + $0x38] sm:$0xff]  ;;  %vm921_vm12 = vcmask 7168  }
   0x4   :  { %1001 = vmatpush3.bf16.msra.mxu0 %v135_v7  ;;  %v1103_v10 = vld [vmem:[%s1412_s1 + $0x8] sm:$0xff]   ;;  %v44_v12 = vld [vmem:[%s1411_s0 + $0x30] sm:$0xff]  ;;  %v1104_v13 = vld [vmem:[%s1412_s1] sm:$0xff]  }
   0x5   :  { %1002 = vmatprep.subr.bf16.mxu0 %v1102_v6  ;;  %v1105_v37 = vld [vmem:[%s1413_s4 + $0x8] sm:$0xff]   ;;  %v1106_v38 = vld [vmem:[%s1413_s4] sm:$0xff]  }
   0x6   :  { %58 = vperm.xlu1 %1100, %v41_v3   ;;  %52 = vperm.xlu0 %1099, %v39_v4   ;;  %v1266_v39 = vld [vmem:[%s1414_s5 + $0x8] sm:$0xff]   ;;  %v1273_v40 = vld [vmem:[%s1414_s5] sm:$0xff]  }
   0x7   :  { %1016 = vmatprep.subr.bf16.mxu1 %v1105_v37  ;;  %v320_v41 = vld [vmem:[%s1415_s3] sm:$0xff] }
   0x8   :  { %1003 = vmatpush3.bf16.msra.mxu0 %v1102_v6  ;;  %1017 = vmatpush3.bf16.msra.mxu1 %v1105_v37  ;;  %v319_v54 = vld [vmem:[%s1416_s2] sm:$0xff]  ;;  %s1145_s2 = smov 64  }
   0x9   :  { %1004 = vmatprep.subr.bf16.mxu0 %v1103_v10  ;;  %1018 = vmatprep.subr.bf16.mxu1 %v1106_v38  ;;  %v322_v55 = vpack.c.bf16 %v319_v54, %v319_v54  ;;  %v943_v56 = vld [vmem:[%s1417_s6] ss:$0 sm:$0xff] }
   0xa   :  { %64 = vperm.xlu1 %1100, %v43_v8   ;;  %61 = vperm.xlu0 %1099, %v42_v9  }
   0xc   :  { %1005 = vmatpush3.bf16.msra.mxu0 %v1103_v10  ;;  %1019 = vmatpush3.bf16.msra.mxu1 %v1106_v38 }
   0xd   :  { %1006 = vmatprep.subr.bf16.mxu0 %v1104_v13  ;;  %1028 = vmatprep.subr.bf16.mxu1 %v1142_v14 }
   0xe   :  { %70 = vperm.xlu1 %1100, %v45_v11   ;;  %67 = vperm.xlu0 %1099, %v44_v12  }
  0x10   :  { %1007 = vmatpush3.bf16.msra.mxu0 %v1104_v13 }
  0x11   :  { %1036 = vmatprep.subr.bf16.mxu0 %v1142_v14 }
  0x12   :  { %383 = vrot.lane.b32.xlu1 %v320_v41, %s1144_s29 }
  0x7d   :  { %v56_v17 = vpop.permute.xlu1 %55  ;;  %v50_v18 = vpop.permute.xlu0 %49 }
  0x7e   :  { %vm74_vm1 = vcmp.eq.s32.totalorder %v47_v16, %v56_v17  ;;  %vm72_vm2 = vcmp.eq.s32.totalorder %v47_v16, %v50_v18 }
  0x7f   :  { %v82_v21 = vsel %vm74_vm1, 1.0, %v1142_v14  ;;  %v80_v22 = vsel %vm72_vm2, 1.0, %v1142_v14 }
  0x81   :  { %v59_v19 = vpop.permute.xlu1 %58  ;;  %v53_v20 = vpop.permute.xlu0 %52 }
  0x82   :  { %vm75_vm3 = vcmp.eq.s32.totalorder %v47_v16, %v59_v19  ;;  %vm73_vm4 = vcmp.eq.s32.totalorder %v47_v16, %v53_v20 }
  0x83   :  { %v83_v23 = vsel %vm75_vm3, 1.0, %v1142_v14  ;;  %v81_v24 = vsel %vm73_vm4, 1.0, %v1142_v14 }
  0x84   :  { %v89_v25 = vpack.c.bf16 %v83_v23, %v82_v21  ;;  %v88_v26 = vpack.c.bf16 %v81_v24, %v80_v22 }
  0x85   :  { %v65_v27 = vpop.permute.xlu1 %64  ;;  %v62_v28 = vpop.permute.xlu0 %61 }
  0x86   :  { %vm77_vm6 = vcmp.eq.s32.totalorder %v47_v16, %v65_v27  ;;  %vm76_vm7 = vcmp.eq.s32.totalorder %v47_v16, %v62_v28  ;;  %1008 = vmatprep.mubr.msk.bf16.mxu0 %vm120_vm5, %v88_v26 }
  0x87   :  { %v85_v29 = vsel %vm77_vm6, 1.0, %v1142_v14  ;;  %v84_v30 = vsel %vm76_vm7, 1.0, %v1142_v14  ;;  %1009 = vmatmul.mubr.msk.bf16.vlgmr.msra.gmra.mxu0 %vm120_vm5, %v89_v25 }
  0x88   :  { %v90_v31 = vpack.c.bf16 %v85_v29, %v84_v30  ;;  %1037 = vmatpush3.bf16.msra.mxu0 %v1266_v39 }
  0x89   :  { %v71_v32 = vpop.permute.xlu1 %70  ;;  %v68_v33 = vpop.permute.xlu0 %67  ;;  %1038 = vmatprep.subr.bf16.mxu0 %v1142_v14 }
  0x8a   :  { %vm79_vm8 = vcmp.eq.s32.totalorder %v47_v16, %v71_v32  ;;  %vm78_vm9 = vcmp.eq.s32.totalorder %v47_v16, %v68_v33  ;;  %1012 = vmatprep.mubr.msk.bf16.mxu0 %vm120_vm5, %v90_v31 }
  0x8b   :  { %v87_v34 = vsel %vm79_vm8, 1.0, %v1142_v14  ;;  %v86_v35 = vsel %vm78_vm9, 1.0, %v1142_v14 }
  0x8c   :  { %v91_v36 = vpack.c.bf16 %v87_v34, %v86_v35  ;;  %1039 = vmatpush3.bf16.msra.mxu0 %v1273_v40 }
  0x8d   :  { %1052 = vmatprep.subr.bf16.mxu0 %v1142_v14  ;;  %v384_v20 = vpop.permute.xlu1 %383 }
  0x8f   :  { %1013 = vmatmul.mubr.msk.bf16.gmra.mxu0 %vm120_vm5, %v91_v36 }
  0x90   :  { %1040 = vmatprep.mubr.msk.bf16.mxu0 %vm1143_vm10, %v1142_v14 }
 0x147   :  { %v1010_v42 = vpop.f32.mrf.mxu0 }
 0x149   :  { %v171_v43 = vpop.f32.mrf.mxu0 }
 0x14b   :  { %v1011_v44 = vpop.f32.mrf.mxu0 }
 0x14c   :  { %v203_v47 = vpack.c.bf16 %v1011_v44, %v1010_v42 }
 0x14d   :  { %v174_v45 = vpop.f32.mrf.mxu0 }
 0x14e   :  { %v202_v46 = vpack.c.bf16 %v174_v45, %v171_v43 }
 0x14f   :  { %v1014_v48 = vpop.f32.mrf.mxu0 }
 0x150   :  { %1020 = vmatprep.mubr.msk.bf16.mxu1 %vm229_vm11, %v202_v46 }
 0x151   :  { %v187_v49 = vpop.f32.mrf.mxu0  ;;  %1021 = vmatmul.mubr.msk.bf16.vlgmr.msra.gmra.mxu1 %vm229_vm11, %v203_v47 }
 0x152   :  { %1029 = vmatpush3.bf16.msra.mxu1 %v1266_v39 }
 0x153   :  { %v1015_v50 = vpop.f32.mrf.mxu0  ;;  %1030 = vmatprep.subr.bf16.mxu1 %v1142_v14 }
 0x154   :  { %v205_v53 = vpack.c.bf16 %v1015_v50, %v1014_v48 }
 0x155   :  { %v190_v51 = vpop.f32.mrf.mxu0 }
 0x156   :  { %v204_v52 = vpack.c.bf16 %v190_v51, %v187_v49  ;;  %1031 = vmatpush3.bf16.msra.mxu1 %v1273_v40 }
 0x157   :  { %1044 = vmatprep.subr.bf16.mxu1 %v1142_v14 }
 0x158   :  { %1024 = vmatprep.mubr.msk.bf16.mxu1 %vm229_vm11, %v204_v52 }
 0x159   :  { %1025 = vmatmul.mubr.msk.bf16.gmra.mxu1 %vm229_vm11, %v205_v53 }
 0x15a   :  { %1032 = vmatprep.mubr.msk.bf16.mxu1 %vm1143_vm10, %v1142_v14 }
 0x161   :  { %1033 = vmatmul.mubr.msk.bf16.vlgmr.msra.gmra.mxu1 %vm229_vm11, %v322_v55 }
 0x162   :  { %1045 = vmatpush3.bf16.msra.mxu1 %v1266_v39  ;;  %1048 = vmatprep.mubr.msk.bf16.mxu1 %vm1143_vm10, %v1142_v14 }
 0x163   :  { %1046 = vmatprep.subr.bf16.mxu1 %v1142_v14 }
 0x166   :  { %1047 = vmatpush3.bf16.msra.mxu1 %v1273_v40 }
 0x167   :  { %1060 = vmatprep.subr.bf16.mxu1 %v1142_v14 }
 0x211   :  { %v1022_v57 = vpop.f32.mrf.mxu1 }
 0x212   :  { %v1306_v58 = vadd.f32 %v1022_v57, %v943_v56 }
 0x213   :  { %v276_v59 = vpop.f32.mrf.mxu1 }
 0x214   :  { %v277_v7 = vadd.f32 %v943_v56, %v276_v59 }
 0x215   :  { %v1023_v60 = vpop.f32.mrf.mxu1 }
 0x216   :  { %v1308_v61 = vadd.f32 %v1023_v60, %v943_v56 }
 0x217   :  { %v279_v62 = vpop.f32.mrf.mxu1 }
 0x218   :  { %v280_v63 = vadd.f32 %v943_v56, %v279_v62 }
 0x219   :  { %v1026_v0 = vpop.f32.mrf.mxu1 }
 0x21a   :  { %v1310_v1 = vadd.f32 %v1026_v0, %v943_v56 }
 0x21b   :  { %v292_v2 = vpop.f32.mrf.mxu1 }
 0x21c   :  { %v1312_v3 = vadd.f32 %v943_v56, %v292_v2 }
 0x21d   :  { %v1027_v4 = vpop.f32.mrf.mxu1 }
 0x21e   :  { %v1314_v5 = vadd.f32 %v1027_v4, %v943_v56 }
 0x21f   :  { %v295_v6 = vpop.f32.mrf.mxu1 }
 0x220   :  { %v1316_v8 = vadd.f32 %v943_v56, %v295_v6 }
 0x221   :  { %v372_v9 = vpop.f32.mrf.mxu1 }
 0x222   :  { %v378_v10 = vadd.f32 %v372_v9, %v277_v7 }
 0x223   :  { %v1034_v11 = vpop.f32.mrf.mxu1 }
 0x224   :  { %1109 = vtanh.f32 %v378_v10 }
 0x225   :  { %v375_v12 = vpop.f32.mrf.mxu1 }
 0x227   :  { %v1035_v13 = vpop.f32.mrf.mxu1 }
 0x231   :  { %v1110_v15 = vpop.eup %1109 }
 0x232   :  { %388 = vrot.lane.b32.xlu0 %v1110_v15, %s1144_s29  ;;  %v380_v16 = vmul.f32 0.5, %v1110_v15 }
 0x234   :  { %v381_v17 = vadd.f32 0.5, %v380_v16 }
 0x236   :  { %v386_v21 = vmul.f32 %v384_v20, %v381_v17 }
 0x2a4   :  { %v389_v18 = vpop.permute.xlu0 %388 }
 0x2a5   :  { %v391_v19 = vmul.f32 %v389_v18, %v381_v17 }
 0x2a7   :  { %393 = vrot.lane.b32.xlu0 %v391_v19, %s1144_s29 }
 0x319   :  { %v394_v22 = vpop.permute.xlu0 %393 }
 0x31a   :  { %v396_v23 = vadd.f32 %v394_v22, %v386_v21 }
 0x31c   :  { %1111 = vtanh.f32 %v396_v23 }
 0x329   :  { %v1112_v24 = vpop.eup %1111 }
 0x32a   :  { %399 = vrot.lane.b32.xlu1 %v1112_v24, %s1144_s29 }
 0x39c   :  { %v400_v25 = vpop.permute.xlu1 %399 }
 0x39d   :  { %v402_v26 = vmul.f32 %v400_v25, %v381_v17 }
 0x39f   :  { %v404_v27 = vpack.c.bf16 %v402_v26, %v402_v26 }
 0x3a1   :  { %406 = vrot.lane.b32.xlu0 %v404_v27, %s1145_s2 }
 0x413   :  { %v407_v28 = vpop.permute.xlu0 %406 }
 0x414   :  { %1041 = vmatmul.mubr.msk.bf16.vlgmr.msra.gmra.mxu0 %vm229_vm11, %v407_v28 }
 0x415   :  { %1053 = vmatpush3.bf16.msra.mxu0 %v1266_v39  ;;  %1056 = vmatprep.mubr.msk.bf16.mxu0 %vm1143_vm10, %v1142_v14 }
 0x416   :  { %1054 = vmatprep.subr.bf16.mxu0 %v1142_v14 }
 0x419   :  { %1055 = vmatpush3.bf16.msra.mxu0 %v1273_v40 }
 0x41a   :  { %1068 = vmatprep.subr.bf16.mxu0 %v1142_v14 }
 0x4d4   :  { %v445_v29 = vpop.f32.mrf.mxu0 }
 0x4d5   :  { %v451_v30 = vadd.f32 %v445_v29, %v280_v63 }
 0x4d6   :  { %v1042_v31 = vpop.f32.mrf.mxu0 }
 0x4d7   :  { %1113 = vtanh.f32 %v451_v30 }
 0x4d8   :  { %v448_v32 = vpop.f32.mrf.mxu0 }
 0x4da   :  { %v1043_v33 = vpop.f32.mrf.mxu0 }
 0x4e4   :  { %v1114_v34 = vpop.eup %1113 }
 0x4e5   :  { %457 = vrot.lane.b32.xlu1 %v1114_v34, %s1144_s29  ;;  %v453_v35 = vmul.f32 0.5, %v1114_v34 }
 0x4e7   :  { %v454_v36 = vadd.f32 0.5, %v453_v35 }
 0x4e9   :  { %v455_v41 = vmul.f32 %v454_v36, %v396_v23 }
 0x557   :  { %v458_v37 = vpop.permute.xlu1 %457 }
 0x558   :  { %v460_v38 = vmul.f32 %v458_v37, %v454_v36 }
 0x55a   :  { %462 = vrot.lane.b32.xlu0 %v460_v38, %s1144_s29 }
 0x5cc   :  { %v463_v42 = vpop.permute.xlu0 %462 }
 0x5cd   :  { %v465_v43 = vadd.f32 %v463_v42, %v455_v41 }
 0x5cf   :  { %1115 = vtanh.f32 %v465_v43 }
 0x5dc   :  { %v1116_v44 = vpop.eup %1115 }
 0x5dd   :  { %468 = vrot.lane.b32.xlu1 %v1116_v44, %s1144_s29 }
 0x64f   :  { %v469_v45 = vpop.permute.xlu1 %468 }
 0x650   :  { %v471_v46 = vmul.f32 %v469_v45, %v454_v36 }
 0x652   :  { %v473_v47 = vpack.c.bf16 %v471_v46, %v471_v46 }
 0x654   :  { %475 = vrot.lane.b32.xlu0 %v473_v47, %s1145_s2 }
 0x6c6   :  { %v476_v48 = vpop.permute.xlu0 %475 }
 0x6c7   :  { %1049 = vmatmul.mubr.msk.bf16.vlgmr.msra.gmra.mxu1 %vm229_vm11, %v476_v48 }
 0x6c8   :  { %1061 = vmatpush3.bf16.msra.mxu1 %v1266_v39  ;;  %1064 = vmatprep.mubr.msk.bf16.mxu1 %vm1143_vm10, %v1142_v14 }
 0x6c9   :  { %1062 = vmatprep.subr.bf16.mxu1 %v1142_v14 }
 0x6cc   :  { %1063 = vmatpush3.bf16.msra.mxu1 %v1273_v40 }
 0x6cd   :  { %1076 = vmatprep.subr.bf16.mxu1 %v1142_v14 }
 0x787   :  { %v514_v49 = vpop.f32.mrf.mxu1 }
 0x788   :  { %v520_v50 = vadd.f32 %v514_v49, %v1306_v58 }
 0x789   :  { %v1050_v51 = vpop.f32.mrf.mxu1 }
 0x78a   :  { %1117 = vtanh.f32 %v520_v50 }
 0x78b   :  { %v517_v52 = vpop.f32.mrf.mxu1 }
 0x78d   :  { %v1051_v53 = vpop.f32.mrf.mxu1 }
 0x797   :  { %v1118_v54 = vpop.eup %1117 }
 0x798   :  { %526 = vrot.lane.b32.xlu1 %v1118_v54, %s1144_s29  ;;  %v522_v55 = vmul.f32 0.5, %v1118_v54 }
 0x79a   :  { %v523_v56 = vadd.f32 0.5, %v522_v55 }
 0x79c   :  { %v524_v60 = vmul.f32 %v523_v56, %v465_v43 }
 0x80a   :  { %v527_v57 = vpop.permute.xlu1 %526 }
 0x80b   :  { %v529_v59 = vmul.f32 %v527_v57, %v523_v56 }
 0x80d   :  { %531 = vrot.lane.b32.xlu0 %v529_v59, %s1144_s29 }
 0x87f   :  { %v532_v62 = vpop.permute.xlu0 %531 }
 0x880   :  { %v534_v63 = vadd.f32 %v532_v62, %v524_v60 }
 0x882   :  { %1119 = vtanh.f32 %v534_v63 }
 0x88f   :  { %v1120_v0 = vpop.eup %1119 }
 0x890   :  { %537 = vrot.lane.b32.xlu1 %v1120_v0, %s1144_s29 }
 0x902   :  { %v538_v58 = vpop.permute.xlu1 %537 }
 0x903   :  { %v540_v2 = vmul.f32 %v538_v58, %v523_v56 }
 0x905   :  { %v542_v4 = vpack.c.bf16 %v540_v2, %v540_v2 }
 0x907   :  { %544 = vrot.lane.b32.xlu0 %v542_v4, %s1145_s2 }
 0x979   :  { %v545_v6 = vpop.permute.xlu0 %544 }
 0x97a   :  { %1057 = vmatmul.mubr.msk.bf16.vlgmr.msra.gmra.mxu0 %vm229_vm11, %v545_v6 }
 0x97b   :  { %1069 = vmatpush3.bf16.msra.mxu0 %v1266_v39  ;;  %1072 = vmatprep.mubr.msk.bf16.mxu0 %vm1143_vm10, %v1142_v14 }
 0x97c   :  { %1070 = vmatprep.subr.bf16.mxu0 %v1142_v14 }
 0x97f   :  { %1071 = vmatpush3.bf16.msra.mxu0 %v1273_v40 }
 0x980   :  { %1084 = vmatprep.subr.bf16.mxu0 %v1142_v14 }
 0xa3a   :  { %v583_v7 = vpop.f32.mrf.mxu0 }
 0xa3b   :  { %v589_v9 = vadd.f32 %v583_v7, %v1308_v61 }
 0xa3c   :  { %v1058_v10 = vpop.f32.mrf.mxu0 }
 0xa3d   :  { %1121 = vtanh.f32 %v589_v9 }
 0xa3e   :  { %v586_v11 = vpop.f32.mrf.mxu0 }
 0xa40   :  { %v1059_v12 = vpop.f32.mrf.mxu0 }
 0xa4a   :  { %v1122_v13 = vpop.eup %1121 }
 0xa4b   :  { %595 = vrot.lane.b32.xlu1 %v1122_v13, %s1144_s29  ;;  %v591_v15 = vmul.f32 0.5, %v1122_v13 }
 0xa4d   :  { %v592_v16 = vadd.f32 0.5, %v591_v15 }
 0xa4f   :  { %v593_v19 = vmul.f32 %v592_v16, %v534_v63 }
 0xabd   :  { %v596_v17 = vpop.permute.xlu1 %595 }
 0xabe   :  { %v598_v18 = vmul.f32 %v596_v17, %v592_v16 }
 0xac0   :  { %600 = vrot.lane.b32.xlu0 %v598_v18, %s1144_s29 }
 0xb32   :  { %v601_v20 = vpop.permute.xlu0 %600 }
 0xb33   :  { %v603_v21 = vadd.f32 %v601_v20, %v593_v19 }
 0xb35   :  { %1123 = vtanh.f32 %v603_v21 }
 0xb42   :  { %v1124_v22 = vpop.eup %1123 }
 0xb43   :  { %606 = vrot.lane.b32.xlu1 %v1124_v22, %s1144_s29 }
 0xbb5   :  { %v607_v61 = vpop.permute.xlu1 %606 }
 0xbb6   :  { %v609_v23 = vmul.f32 %v607_v61, %v592_v16 }
 0xbb8   :  { %v611_v24 = vpack.c.bf16 %v609_v23, %v609_v23 }
 0xbba   :  { %613 = vrot.lane.b32.xlu0 %v611_v24, %s1145_s2 }
 0xc2c   :  { %v614_v25 = vpop.permute.xlu0 %613 }
 0xc2d   :  { %1065 = vmatmul.mubr.msk.bf16.vlgmr.msra.gmra.mxu1 %vm229_vm11, %v614_v25 }
 0xc2e   :  { %1077 = vmatpush3.bf16.msra.mxu1 %v1266_v39  ;;  %1080 = vmatprep.mubr.msk.bf16.mxu1 %vm1143_vm10, %v1142_v14 }
 0xc2f   :  { %1078 = vmatprep.subr.bf16.mxu1 %v1142_v14 }
 0xc32   :  { %1079 = vmatpush3.bf16.msra.mxu1 %v1273_v40 }
 0xced   :  { %v652_v26 = vpop.f32.mrf.mxu1 }
 0xcee   :  { %v658_v27 = vadd.f32 %v652_v26, %v1312_v3 }
 0xcef   :  { %v1066_v28 = vpop.f32.mrf.mxu1 }
 0xcf0   :  { %1125 = vtanh.f32 %v658_v27  ;;  %v960_v27 = vld [vmem:[%s1418_s7] ss:$0 sm:$0xff]  ;;  %s1146_s7 = smov 96  }
 0xcf1   :  { %v655_v29 = vpop.f32.mrf.mxu1 }
 0xcf3   :  { %v1067_v30 = vpop.f32.mrf.mxu1 }
 0xcfd   :  { %v1126_v31 = vpop.eup %1125 }
 0xcfe   :  { %664 = vrot.lane.b32.xlu1 %v1126_v31, %s1144_s29  ;;  %v660_v32 = vmul.f32 0.5, %v1126_v31 }
 0xd00   :  { %v661_v33 = vadd.f32 0.5, %v660_v32 }
 0xd02   :  { %v662_v36 = vmul.f32 %v661_v33, %v603_v21 }
 0xd70   :  { %v665_v34 = vpop.permute.xlu1 %664 }
 0xd71   :  { %v667_v35 = vmul.f32 %v665_v34, %v661_v33  ;;  %v17_v34 = vstv %s1419_s8 }
 0xd72   :  { %18 = vst [vmem:[#allocation3] sm:$0x1] %v17_v34 }
 0xd73   :  { %669 = vrot.lane.b32.xlu0 %v667_v35, %s1144_s29 }
 0xde5   :  { %v670_v37 = vpop.permute.xlu0 %669 }
 0xde6   :  { %v672_v38 = vadd.f32 %v670_v37, %v662_v36 }
 0xde8   :  { %1127 = vtanh.f32 %v672_v38 }
 0xdf5   :  { %v1128_v41 = vpop.eup %1127 }
 0xdf6   :  { %675 = vrot.lane.b32.xlu1 %v1128_v41, %s1144_s29 }
 0xe68   :  { %v676_v3 = vpop.permute.xlu1 %675 }
 0xe69   :  { %v678_v42 = vmul.f32 %v676_v3, %v661_v33  ;;  %v961_v3 = vld [vmem:[#allocation3] ss:$0 sm:$0xff] }
 0xe6b   :  { %v680_v43 = vpack.c.bf16 %v678_v42, %v678_v42 }
 0xe6d   :  { %682 = vrot.lane.b32.xlu0 %v680_v43, %s1145_s2 }
 0xedf   :  { %v683_v44 = vpop.permute.xlu0 %682 }
 0xee0   :  { %1073 = vmatmul.mubr.msk.bf16.vlgmr.msra.gmra.mxu0 %vm229_vm11, %v683_v44 }
 0xee1   :  { %1085 = vmatpush3.bf16.msra.mxu0 %v1266_v39  ;;  %1088 = vmatprep.mubr.msk.bf16.mxu0 %vm1143_vm10, %v1142_v14 }
 0xee2   :  { %1086 = vmatprep.subr.bf16.mxu0 %v1142_v14 }
 0xee5   :  { %1087 = vmatpush3.bf16.msra.mxu0 %v1273_v40 }
 0xfa0   :  { %v721_v45 = vpop.f32.mrf.mxu0 }
 0xfa1   :  { %v727_v46 = vadd.f32 %v721_v45, %v1316_v8 }
 0xfa2   :  { %v1074_v47 = vpop.f32.mrf.mxu0 }
 0xfa3   :  { %1129 = vtanh.f32 %v727_v46 }
 0xfa4   :  { %v724_v48 = vpop.f32.mrf.mxu0 }
 0xfa6   :  { %v1075_v49 = vpop.f32.mrf.mxu0 }
 0xfb0   :  { %v1130_v50 = vpop.eup %1129 }
 0xfb1   :  { %733 = vrot.lane.b32.xlu1 %v1130_v50, %s1144_s29  ;;  %v729_v51 = vmul.f32 0.5, %v1130_v50 }
 0xfb3   :  { %v730_v52 = vadd.f32 0.5, %v729_v51 }
 0xfb5   :  { %v731_v54 = vmul.f32 %v730_v52, %v672_v38 }
0x1023   :  { %v734_v39 = vpop.permute.xlu1 %733 }
0x1024   :  { %v736_v53 = vmul.f32 %v734_v39, %v730_v52 }
0x1026   :  { %738 = vrot.lane.b32.xlu0 %v736_v53, %s1144_s29 }
0x1098   :  { %v739_v14 = vpop.permute.xlu0 %738 }
0x1099   :  { %v741_v55 = vadd.f32 %v739_v14, %v731_v54 }
0x109b   :  { %1131 = vtanh.f32 %v741_v55 }
0x10a8   :  { %v1132_v40 = vpop.eup %1131 }
0x10a9   :  { %744 = vrot.lane.b32.xlu1 %v1132_v40, %s1144_s29 }
0x111b   :  { %v745_v8 = vpop.permute.xlu1 %744 }
0x111c   :  { %v747_v56 = vmul.f32 %v745_v8, %v730_v52 }
0x111e   :  { %v749_v57 = vpack.c.bf16 %v747_v56, %v747_v56 }
0x1120   :  { %751 = vrot.lane.b32.xlu0 %v749_v57, %s1145_s2 }
0x1192   :  { %v752_v59 = vpop.permute.xlu0 %751 }
0x1193   :  { %1081 = vmatmul.mubr.msk.bf16.vlgmr.msra.gmra.mxu1 %vm229_vm11, %v752_v59 }
0x1253   :  { %v790_v60 = vpop.f32.mrf.mxu1 }
0x1254   :  { %v796_v62 = vadd.f32 %v790_v60, %v1310_v1 }
0x1255   :  { %v1082_v63 = vpop.f32.mrf.mxu1 }
0x1256   :  { %1133 = vtanh.f32 %v796_v62 }
0x1257   :  { %v793_v0 = vpop.f32.mrf.mxu1 }
0x1259   :  { %v1083_v58 = vpop.f32.mrf.mxu1 }
0x1263   :  { %v1134_v2 = vpop.eup %1133 }
0x1264   :  { %802 = vrot.lane.b32.xlu1 %v1134_v2, %s1144_s29  ;;  %v798_v4 = vmul.f32 0.5, %v1134_v2 }
0x1266   :  { %v799_v6 = vadd.f32 0.5, %v798_v4 }
0x1268   :  { %v800_v10 = vmul.f32 %v799_v6, %v741_v55 }
0x12d6   :  { %v803_v7 = vpop.permute.xlu1 %802 }
0x12d7   :  { %v805_v9 = vmul.f32 %v803_v7, %v799_v6 }
0x12d9   :  { %807 = vrot.lane.b32.xlu0 %v805_v9, %s1144_s29 }
0x134b   :  { %v808_v11 = vpop.permute.xlu0 %807 }
0x134c   :  { %v810_v12 = vadd.f32 %v808_v11, %v800_v10 }
0x134e   :  { %1135 = vtanh.f32 %v810_v12 }
0x135b   :  { %v1136_v13 = vpop.eup %1135 }
0x135c   :  { %813 = vrot.lane.b32.xlu1 %v1136_v13, %s1144_s29 }
0x13ce   :  { %v814_v1 = vpop.permute.xlu1 %813 }
0x13cf   :  { %v816_v15 = vmul.f32 %v814_v1, %v799_v6 }
0x13d1   :  { %v818_v16 = vpack.c.bf16 %v816_v15, %v816_v15 }
0x13d3   :  { %820 = vrot.lane.b32.xlu0 %v818_v16, %s1145_s2 }
0x1445   :  { %v821_v17 = vpop.permute.xlu0 %820 }
0x1446   :  { %1089 = vmatmul.mubr.msk.bf16.vlgmr.msra.gmra.mxu0 %vm229_vm11, %v821_v17 }
0x1506   :  { %v859_v18 = vpop.f32.mrf.mxu0 }
0x1507   :  { %v865_v19 = vadd.f32 %v859_v18, %v1314_v5 }
0x1508   :  { %v1090_v20 = vpop.f32.mrf.mxu0 }
0x1509   :  { %1137 = vtanh.f32 %v865_v19 }
0x150a   :  { %v862_v21 = vpop.f32.mrf.mxu0 }
0x150c   :  { %v1091_v22 = vpop.f32.mrf.mxu0 }
0x1516   :  { %v1138_v61 = vpop.eup %1137 }
0x1517   :  { %871 = vrot.lane.b32.xlu1 %v1138_v61, %s1144_s29  ;;  %v867_v23 = vmul.f32 0.5, %v1138_v61 }
0x1519   :  { %v868_v24 = vadd.f32 0.5, %v867_v23 }
0x151b   :  { %v869_v5 = vmul.f32 %v868_v24, %v810_v12 }
0x1589   :  { %v872_v25 = vpop.permute.xlu1 %871 }
0x158a   :  { %v874_v26 = vmul.f32 %v872_v25, %v868_v24 }
0x158c   :  { %876 = vrot.lane.b32.xlu0 %v874_v26, %s1144_s29 }
0x1590   :  { %902 = vrot.lane.b32.xlu0 %v960_v27, %s1145_s2 }
0x15fe   :  { %v877_v28 = vpop.permute.xlu0 %876 }
0x15ff   :  { %v879_v29 = vadd.f32 %v877_v28, %v869_v5 }
0x1601   :  { %1139 = vtanh.f32 %v879_v29 }
0x1602   :  { %v903_v32 = vpop.permute.xlu0 %902 }
0x160e   :  { %v1140_v30 = vpop.eup %1139 }
0x160f   :  { %882 = vrot.lane.b32.xlu1 %v1140_v30, %s1144_s29 }
0x1681   :  { %v883_v31 = vpop.permute.xlu1 %882 }
0x1682   :  { %v885_v33 = vmul.f32 %v883_v31, %v868_v24 }
0x1684   :  { %v905_v35 = vmul.f32 %v903_v32, %v885_v33 }
0x1686   :  { %907 = vrot.lane.b32.xlu1 %v905_v35, %s1145_s2 }
0x168a   :  { %887 = vrot.lane.b32.xlu1 %v885_v33, %s1145_s2 }
0x168e   :  { %892 = vrot.lane.b32.xlu1 %v879_v29, %s1146_s7 }
0x16f8   :  { %v908_v36 = vpop.permute.xlu1 %907 }
0x16f9   :  { %v910_v37 = vsel %vm229_vm11, %v908_v36, 0.0 }
0x16fa   :  { %911 = vadd.xlane.f32.xlu0 %v910_v37 }
0x16fc   :  { %v888_v38 = vpop.permute.xlu1 %887 }
0x16fd   :  { %890 = vst.msk [vmem:[%s1420_s10] sm:$0xff] %vm229_vm11, %v888_v38 }
0x1700   :  { %v893_v41 = vpop.permute.xlu1 %892 }
0x1701   :  { %895 = vst.msk [vmem:[%s1421_s11] sm:$0xff] %vm229_vm11, %v893_v41 }
0x1783   :  { %v912_v42 = vpop.xlane.xlu0 %911 }
0x1784   :  { %v920_v43 = vadd.f32 %v961_v3, %v912_v42 }
0x1786   :  { %922 = vst.msk [vmem:[%s1422_s9] sm:$0xff] %vm921_vm12, %v920_v43 }

</bundles_post_ra>
